<compile_context>
chip_gen: v7x
topology: tpu7x:2x2x1
jax: 0.10.0
libtpu: 0.0.40
codegen_flags: <defaults>
</compile_context>

<pallas_src>
import functools

import jax
import jax.numpy as jnp
from jax.experimental import pallas as pl
from jax.experimental.pallas import tpu as pltpu


def _cbr_kernel(p_ref, w_ref, gb_ref, o_ref, *, n_valid, eps):
    # p_ref:  (K*C_in, LANES)  im2col patches, lane-padded with zero columns
    # w_ref:  (C_out, K*C_in)  conv weights flattened tap-major (row = k*C_in + c)
    # gb_ref: (C_out, 2)       packed [gamma | beta]
    # o_ref:  (C_out, LANES)   lane-dense output slab (padded lanes sliced off
    #                          by the wrapper)

    # --- Conv1d as ONE MXU matmul (bias omitted: cancels through train BN) ---
    y = jnp.dot(w_ref[...], p_ref[...],
                preferred_element_type=jnp.float32)            # (C_out, LANES) f32

    # --- One-pass BatchNorm1d batch statistics.  Zero-padded lane columns of
    #     the patches give exactly-zero y columns, so they contribute nothing
    #     to the sums; divide by the true element count, not LANES. ---
    inv_n = jnp.float32(1.0 / n_valid)
    s1 = jnp.sum(y, axis=1, keepdims=True)                     # (C_out, 1)
    s2 = jnp.sum(y * y, axis=1, keepdims=True)                 # (C_out, 1)
    mean = s1 * inv_n
    var = jnp.maximum(s2 * inv_n - mean * mean, 0.0)           # biased batch var
    inv_std = jax.lax.rsqrt(var + eps)

    gamma = gb_ref[:, 0:1].astype(jnp.float32)                 # (C_out, 1)
    beta = gb_ref[:, 1:2].astype(jnp.float32)                  # (C_out, 1)
    scale = gamma * inv_std
    shift = beta - mean * scale

    # --- ReLU + unmasked lane-dense store ---
    o_ref[...] = jnp.maximum(y * scale + shift, 0.0).astype(o_ref.dtype)


def oned_conv_bn_relu(x, w, b, gamma, beta, *, stride=1, padding=0, eps=1e-5,
                      mxu_dtype=jnp.bfloat16):
    """x: (N, C_in, L) f32; w: (C_out, C_in, K); b/gamma/beta: (C_out,).

    Matches PyTorch Conv1d(padding_mode='replicate') -> BatchNorm1d (training
    mode) -> ReLU.  `b` is accepted for API parity but never sent to the
    kernel: a per-channel constant added before train-mode BN cancels exactly.
    """
    del b  # exact no-op through training-mode BatchNorm
    N, C_in, L = x.shape
    C_out, _, K = w.shape

    if padding > 0:
        # padding_mode='replicate' -> edge padding (wrapper glue)
        x = jnp.pad(x, ((0, 0), (0, 0), (padding, padding)), mode="edge")
    L_pad = L + 2 * padding
    L_out = (L_pad - K) // stride + 1
    span = (L_out - 1) * stride + 1

    # Wrapper-side im2col (layout plumbing only, handled by XLA) so the kernel
    # contains zero lane/sublane shuffles.  Row index = k*C_in + c; column
    # index = n*L_out + t.  Handles stride>1 here, not in the kernel.
    taps = []
    for k in range(K):
        xs = jax.lax.slice_in_dim(x, k, k + span, axis=2)      # (N, C_in, span)
        if stride > 1:
            xs = xs[:, :, ::stride]                            # (N, C_in, L_out)
        taps.append(xs)
    patches = jnp.concatenate(taps, axis=1)                    # (N, K*C_in, L_out)
    patches = jnp.transpose(patches, (1, 0, 2)).reshape(K * C_in, N * L_out)

    # Lane-dense output: zero-pad the lane axis up to a multiple of 128 so the
    # kernel's store is unmasked; BN sums are unaffected (padded y cols == 0).
    n_valid = N * L_out
    lanes = max(128, ((n_valid + 127) // 128) * 128)
    if lanes > n_valid:
        patches = jnp.pad(patches, ((0, 0), (0, lanes - n_valid)))

    # Flatten weights tap-major and feed the MXU in bf16 (f32 accumulation in
    # the kernel); BN/ReLU math stays f32 in-kernel (v5e has no bf16 VPU/EUP).
    w_flat = jnp.transpose(w, (0, 2, 1)).reshape(C_out, K * C_in)
    patches = patches.astype(mxu_dtype)
    w_flat = w_flat.astype(mxu_dtype)

    # Pack gamma/beta into a single (C_out, 2) input: one DMA, one VMEM tile.
    gb = jnp.stack([gamma, beta], axis=1).astype(jnp.float32)

    kern = functools.partial(_cbr_kernel, n_valid=float(n_valid), eps=eps)
    vmem = pl.BlockSpec(memory_space=pltpu.MemorySpace.VMEM)

    # Single grid point: the whole problem is a few vregs, fully VMEM-resident.
    # TODO(synk): for large N*L_out, add a lane-axis grid (two-pass BN: stats
    # pass + normalize pass, partial sums in VMEM scratch finalized with
    # pl.when), mark an independent axis "parallel" for v7x's 2 TensorCores,
    # and budget tiles for ~half of its 64 MiB VMEM.
    # TODO(synk): BatchNorm running_mean/running_var are not tracked/updated;
    # this implements the training-mode forward output only.
    out2d = pl.pallas_call(
        kern,
        out_shape=jax.ShapeDtypeStruct((C_out, lanes), x.dtype),
        in_specs=[vmem, vmem, vmem],
        out_specs=vmem,
    )(patches, w_flat, gb)

    out2d = out2d[:, :n_valid]
    # Back to PyTorch NCL layout (layout plumbing only).
    return jnp.transpose(out2d.reshape(C_out, N, L_out), (1, 0, 2))


def _reference(x, w, b, gamma, beta, *, stride, padding, eps=1e-5):
    # Pure-JAX f32 reference replicating the PyTorch forward (bias included, to
    # validate that dropping it in the kernel is a no-op through train-mode BN).
    if padding > 0:
        x = jnp.pad(x, ((0, 0), (0, 0), (padding, padding)), mode="edge")
    y = jax.lax.conv_general_dilated(
        x, w, window_strides=(stride,), padding="VALID",
        dimension_numbers=("NCH", "OIH", "NCH"))
    y = y + b[None, :, None]
    mean = jnp.mean(y, axis=(0, 2), keepdims=True)
    var = jnp.mean((y - mean) ** 2, axis=(0, 2), keepdims=True)
    y = (y - mean) / jnp.sqrt(var + eps) * gamma[None, :, None] + beta[None, :, None]
    return jnp.maximum(y, 0.0)


if __name__ == "__main__":
    # Module-consistent small shapes:
    # in_channel_count=4, out_channel_count=8, kernel=3, stride=1, padding=1.
    N, C_in, C_out, L, K, STRIDE, PAD = 2, 4, 8, 16, 3, 1, 1

    key = jax.random.PRNGKey(0)
    kx, kw, kb, kg, kbeta = jax.random.split(key, 5)

    x = jax.random.normal(kx, (N, C_in, L), dtype=jnp.float32)

    # Conv1d default init: U(-bound, bound) with bound = 1/sqrt(C_in * K)
    bound = 1.0 / jnp.sqrt(jnp.float32(C_in * K))
    w = jax.random.uniform(kw, (C_out, C_in, K), jnp.float32, -bound, bound)
    b = jax.random.uniform(kb, (C_out,), jnp.float32, -bound, bound)

    # BatchNorm1d default affine init: gamma=1, beta=0
    gamma = jnp.ones((C_out,), jnp.float32)
    beta = jnp.zeros((C_out,), jnp.float32)

    ref = _reference(x, w, b, gamma, beta, stride=STRIDE, padding=PAD)

    # 1) f32 MXU feed: tight tolerance against the f32 reference.
    out_f32 = oned_conv_bn_relu(x, w, b, gamma, beta, stride=STRIDE, padding=PAD,
                                mxu_dtype=jnp.float32)
    out_f32 = jax.block_until_ready(out_f32)
    assert out_f32.shape == ref.shape == (N, C_out, L)
    assert jnp.allclose(out_f32, ref, rtol=1e-4, atol=1e-4), (
        f"f32 max abs err = {jnp.max(jnp.abs(out_f32 - ref))}")

    # 2) bf16 MXU feed (default, fast path): loose tolerance for bf16 inputs.
    out_bf16 = oned_conv_bn_relu(x, w, b, gamma, beta, stride=STRIDE, padding=PAD)
    out_bf16 = jax.block_until_ready(out_bf16)
    assert jnp.allclose(out_bf16, ref, rtol=5e-2, atol=5e-2), (
        f"bf16 max abs err = {jnp.max(jnp.abs(out_bf16 - ref))}")

    # 3) stride=2, padding=0, non-trivial affine: exercises the (fixed)
    #    strided path (now handled wrapper-side) and the gamma/beta packing.
    gamma2 = 1.0 + 0.1 * jax.random.normal(kg, (C_out,), jnp.float32)
    beta2 = 0.1 * jax.random.normal(kbeta, (C_out,), jnp.float32)
    out_s2 = oned_conv_bn_relu(x, w, b, gamma2, beta2, stride=2, padding=0,
                               mxu_dtype=jnp.float32)
    out_s2 = jax.block_until_ready(out_s2)
    ref_s2 = _reference(x, w, b, gamma2, beta2, stride=2, padding=0)
    assert out_s2.shape == ref_s2.shape
    assert jnp.allclose(out_s2, ref_s2, rtol=1e-4, atol=1e-4), (
        f"stride-2 max abs err = {jnp.max(jnp.abs(out_s2 - ref_s2))}")

    print("KERNEL_OK")
</pallas_src>

<mosaic_0001>
module attributes {stable_mosaic.version = 11 : i64} {
  func.func @_cbr_kernel(%arg0: memref<12x128xf32, #tpu.memory_space<vmem>>, %arg1: memref<8x12xf32, #tpu.memory_space<vmem>>, %arg2: memref<8x2xf32, #tpu.memory_space<vmem>>, %arg3: memref<8x128xf32, #tpu.memory_space<vmem>>) attributes {dimension_semantics = [], scalar_prefetch = 0 : i64, scratch_operands = 0 : i64, tpu.core_type = #tpu.core_type<tc>} {
    %c0 = arith.constant 0 : index
    %c0_0 = arith.constant 0 : index
    %0 = vector.load %arg1[%c0, %c0_0] : memref<8x12xf32, #tpu.memory_space<vmem>>, vector<8x12xf32>
    %c0_1 = arith.constant 0 : index
    %c0_2 = arith.constant 0 : index
    %1 = vector.load %arg0[%c0_1, %c0_2] : memref<12x128xf32, #tpu.memory_space<vmem>>, vector<12x128xf32>
    %cst = arith.constant dense<0.000000e+00> : vector<8x128xf32>
    %2 = tpu.matmul %0, %1, %cst {dimension_numbers = #tpu.dot_dimension_numbers<[1], [0], [0], [1], [0, 0, 1, 1], [], []>} : vector<8x12xf32>, vector<12x128xf32>, vector<8x128xf32> -> vector<8x128xf32>
    %cst_3 = arith.constant dense<0.000000e+00> : vector<8xf32>
    %3 = vector.multi_reduction <add>, %2, %cst_3 [1] : vector<8x128xf32> to vector<8xf32>
    %4 = vector.shape_cast %3 : vector<8xf32> to vector<8x1xf32>
    %5 = arith.mulf %2, %2 : vector<8x128xf32>
    %cst_4 = arith.constant dense<0.000000e+00> : vector<8xf32>
    %6 = vector.multi_reduction <add>, %5, %cst_4 [1] : vector<8x128xf32> to vector<8xf32>
    %7 = vector.shape_cast %6 : vector<8xf32> to vector<8x1xf32>
    %cst_5 = arith.constant 3.125000e-02 : f32
    %8 = vector.broadcast %cst_5 : f32 to vector<8x1xf32>
    %9 = arith.mulf %4, %8 : vector<8x1xf32>
    %cst_6 = arith.constant 3.125000e-02 : f32
    %10 = vector.broadcast %cst_6 : f32 to vector<8x1xf32>
    %11 = arith.mulf %7, %10 : vector<8x1xf32>
    %12 = arith.mulf %9, %9 : vector<8x1xf32>
    %13 = arith.subf %11, %12 : vector<8x1xf32>
    %cst_7 = arith.constant 0.000000e+00 : f32
    %14 = vector.broadcast %cst_7 : f32 to vector<8x1xf32>
    %15 = arith.maximumf %13, %14 : vector<8x1xf32>
    %cst_8 = arith.constant 9.99999974E-6 : f32
    %16 = vector.broadcast %cst_8 : f32 to vector<8x1xf32>
    %17 = arith.addf %15, %16 : vector<8x1xf32>
    %18 = math.rsqrt %17 : vector<8x1xf32>
    %c0_9 = arith.constant 0 : index
    %c0_10 = arith.constant 0 : index
    %19 = vector.load %arg2[%c0_9, %c0_10] : memref<8x2xf32, #tpu.memory_space<vmem>>, vector<8x1xf32>
    %c0_11 = arith.constant 0 : index
    %c1 = arith.constant 1 : index
    %20 = vector.load %arg2[%c0_11, %c1] : memref<8x2xf32, #tpu.memory_space<vmem>>, vector<8x1xf32>
    %21 = arith.mulf %19, %18 : vector<8x1xf32>
    %22 = arith.mulf %9, %21 : vector<8x1xf32>
    %23 = arith.subf %20, %22 : vector<8x1xf32>
    %24 = vector.broadcast %21 : vector<8x1xf32> to vector<8x128xf32>
    %25 = arith.mulf %2, %24 : vector<8x128xf32>
    %26 = vector.broadcast %23 : vector<8x1xf32> to vector<8x128xf32>
    %27 = arith.addf %25, %26 : vector<8x128xf32>
    %cst_12 = arith.constant 0.000000e+00 : f32
    %28 = vector.broadcast %cst_12 : f32 to vector<8x128xf32>
    %29 = arith.maximumf %27, %28 : vector<8x128xf32>
    %c0_13 = arith.constant 0 : index
    %c0_14 = arith.constant 0 : index
    %30 = vector.load %arg3[%c0_13, %c0_14] : memref<8x128xf32, #tpu.memory_space<vmem>>, vector<8x128xf32>
    tpu.vector_store %arg3[%c0_13, %c0_14], %29 {strides = array<i32>} : memref<8x128xf32, #tpu.memory_space<vmem>>, vector<8x128xf32>,
    return
  }
}

</mosaic_0001>

<bundles_post_ra>
// kernel: tpu_custom_call.1
= control target key start
LH: loop header
LB: loop body
LE: loop exit
PB: predicated region body
PF: predicated region fallthrough
CT: control target
= control target key end

     0   :  { %8 = vsyncpa [#allocation3], 0  ;;  %s299_s0 = inlined_call_operand.hbm [shape: f32[12,128], index: 0, kind: input, shape index: {}]   ;;  %s300_s1 = inlined_call_operand.vmem [shape: f32[8,12], index: 1, kind: input, shape index: {}]   ;;  %s301_s2 = inlined_call_operand.vmem [shape: f32[8,2], index: 2, kind: input, shape index: {}]   ;;  %s302_s3 = inlined_call_operand.hbm [shape: f32[8,128], index: 3, kind: output, shape index: {}]  }
   0x1   :  { %9 = vsyncpa [#allocation4], 0  ;;  %s238_s12 = smov [#allocation2]   ;;  %s190_s16 = scalar_lea.hbm %s299_s0, 256 }
   0x2   :  { %s15_s13 = sshll.u32 %s238_s12, 4  ;;  %p191_p0 = scmp.ne.s32.totalorder %s299_s0, %s190_s16  ;;  %s16_s13 = int_to_ptr.vmem [resolvable:$true] %s15_s13 }
   0x3   :  { %p194_p1 = scmp.lt.u32.totalorder %s190_s16, %s299_s0 }
   0x5   :  { %p196_p2 = pnand %p194_p1, %p191_p0 }
   0x7   :  { %199 = shalt.err (!%p196_p2)
}
   0x8   :  { %s200_s21 = scalar_lea.vmem %s16_s13, 256  ;;  %p205_p4 = scmp.lt.s32.totalorder %s16_s13, %s16_s13 }
   0x9   :  { %p201_p3 = scmp.ne.s32.totalorder %s16_s13, %s200_s21  ;;  %p206_p5 = scmp.lt.s32.totalorder %s200_s21, %s200_s21 }
   0xb   :  { %p207_p6 = por %p206_p5, %p205_p4 }
   0xd   :  { %p208_p7 = pnand %p207_p6, %p201_p3 }
   0xf   :  { %211 = shalt.err (!%p208_p7)
}
  0x10   :  { %s239_s22 = smov 128   ;;  %s240_s23 = smov 8  }
  0x11   :  { %21 = dma.hbm_to_vmem [thread:$0]  %s299_s0, 256, %s16_s13, [#allocation3], %s239_s22, %s239_s22, %s240_s23  }
  0x12   :  { %234 = dma.done.wait [#allocation3], 256  }
  0x13   :  { %235 = vsyncadd [#allocation3], 4294967040  ;;  %v241_v0 = vmov 0.0|0.0   ;;  %vm242_vm0 = vmmov 0   ;;  %v243_v1 = vmov 0.0   ;;  %vm36_vm1 = vcmask 1043456  }
  0x14   :  { %171 = vmatprep.subr.bf16.mxu0 %v241_v0  ;;  %168 = vmatprep.mubr.msk.f32.mxu0 %vm242_vm0, %v243_v1  ;;  %v30_v2 = vld [vmem:[#allocation2] sm:$0xff]  ;;  %v31_v3 = vld [vmem:[#allocation2 + $0x8] sm:$0xf]  ;;  %vm244_vm2 = vmmov 1   ;;  %vm32_vm4 = vcmask 97280   ;;  %v245_v9 = vmov 0  }
  0x15   :  { %vm173_vm3 = vmpackc.low %vm36_vm1, %vm244_vm2  ;;  %v172_v4 = vpack.c.bf16 %v31_v3, %v30_v2  ;;  %v29_v5 = vld [vmem:[%s300_s1] sm:$0xff]  ;;  %186 = vset.pattern.permute.xlu1 %v245_v9  ;;  %v246_v18 = vmov 1   ;;  %s247_s28 = smov 1   ;;  %s248_s29 = smov [#allocation5]  }
  0x16   :  { %187 = vset.pattern.permute.xlu0 %v246_v18  ;;  %v122_v19 = vld [vmem:[%s301_s2] sm:$0xff]  ;;  %s150_s30 = sshll.u32 %s248_s29, 4  ;;  %s151_s30 = int_to_ptr.vmem [resolvable:$true] %s150_s30 }
  0x17   :  { %174 = vmatpush3.bf16.msk.msra.mxu0 %vm173_vm3, %v172_v4  ;;  %s212_s4 = scalar_lea.vmem %s151_s30, 128  ;;  %p217_p9 = scmp.lt.s32.totalorder %s151_s30, %s151_s30 }
  0x18   :  { %p213_p8 = scmp.ne.s32.totalorder %s151_s30, %s212_s4  ;;  %p218_p10 = scmp.lt.s32.totalorder %s212_s4, %s212_s4 }
  0x1a   :  { %169 = vmatmul.mubr.msk.f32.vlgmr.msra.gmra.mrb[0].mxu0 %vm32_vm4, %v29_v5  ;;  %p219_p11 = por %p218_p10, %p217_p9 }
  0x1c   :  { %p220_p12 = pnand %p219_p11, %p213_p8 }
  0xed   :  { %v106_v6 = vpop.f32.mrb[0].mxu0 }
  0xee   :  { %110 = vadd.xlane.f32.xlu0 %v106_v6  ;;  %v170_v7 = vpop.f32.mrb[1].mxu0  ;;  %v112_v8 = vmul.f32 %v106_v6, %v106_v6 }
  0xf2   :  { %113 = vadd.xlane.f32.xlu0 %v112_v8 }
 0x17b   :  { %v111_v10 = vpop.xlane.xlu0 %110 }
 0x17c   :  { %v115_v11 = vmul.f32 0.03125, %v111_v10 }
 0x17e   :  { %v117_v13 = vmul.f32 %v115_v11, %v115_v11 }
 0x17f   :  { %v114_v12 = vpop.xlane.xlu0 %113 }
 0x180   :  { %v116_v14 = vmul.f32 0.03125, %v114_v12 }
 0x182   :  { %v118_v15 = vsub.f32 %v116_v14, %v117_v13 }
 0x184   :  { %v119_v16 = vmax.f32 %v118_v15, 0.0 }
 0x186   :  { %v120_v17 = vadd.f32 1e-05, %v119_v16 }
 0x188   :  { %188 = vrsqrt.f32 %v120_v17 }
 0x192   :  { %v189_v20 = vpop.eup %188 }
 0x193   :  { %v123_v21 = vmul.f32 %v189_v20, %v122_v19 }
 0x195   :  { %v124_v22 = vmul.f32 %v123_v21, %v115_v11 }
 0x197   :  { %126 = vrot.lane.b32.xlu1 %v124_v22, %s247_s28 }
 0x19b   :  { %132 = vperm.xlu1 %186, %v123_v21  }
 0x209   :  { %v127_v23 = vpop.permute.xlu1 %126 }
 0x20a   :  { %v129_v24 = vsub.f32 %v122_v19, %v127_v23 }
 0x20c   :  { %138 = vperm.xlu0 %187, %v129_v24  }
 0x21a   :  { %v133_v25 = vpop.permute.xlu1 %132 }
 0x21b   :  { %v135_v26 = vmul.f32 %v133_v25, %v106_v6 }
 0x28b   :  { %v139_v27 = vpop.permute.xlu0 %138 }
 0x28c   :  { %v141_v28 = vadd.f32 %v139_v27, %v135_v26 }
 0x28e   :  { %v142_v29 = vmax.f32 %v141_v28, 0.0 }
 0x290   :  { %143 = vst [vmem:[#allocation5] sm:$0xff] %v142_v29 }
 0x291   :  { %223 = shalt.err (!%p220_p12)
}
 0x292   :  { %s224_s6 = scalar_lea.hbm %s302_s3, 128 }
 0x293   :  { %p225_p13 = scmp.ne.s32.totalorder %s302_s3, %s224_s6  ;;  %p228_p0 = scmp.lt.u32.totalorder %s224_s6, %s302_s3 }
 0x295   :  { %p230_p1 = pnand %p228_p0, %p225_p13 }
 0x297   :  { %233 = shalt.err (!%p230_p1)
}
 0x298   :  { %153 = dma.vmem_to_hbm [thread:$0]  %s151_s30, 128, %s302_s3, [#allocation4]  }
 0x299   :  { %236 = dma.done.wait [#allocation4], 128  }
 0x29a   :  { %237 = vsyncadd [#allocation4], 4294967168 }
 0x29b   :  { %157 = vsyncpa [#allocation3], 1 }
 0x29c   :  { %158 = vsyncpa [#allocation4], 1 }

</bundles_post_ra>
